<compile_context>
chip_gen: v7x
topology: tpu7x:2x2x1
jax: 0.10.0
libtpu: 0.0.40
codegen_flags: <defaults>
</compile_context>

<pallas_src>
import functools

import jax
import jax.numpy as jnp
from jax.experimental import pallas as pl
from jax.experimental.pallas import tpu as pltpu


def mean_pool_kernel(h_ref, m_ref, inv_ref, o_ref, *, seq_len, ts, edge_mask):
    # h_ref:   (TB, TS, TH) hidden-state tile (native dtype)
    # m_ref:   (TB, TS, 1)  mask tile (hidden dtype)
    # inv_ref: (TB, 1, 1)   f32 precomputed 1 / clamp(mask_count, 1e-9)
    # o_ref:   (TB, 1, TH)  f32 output block; resident across the s axis (acts as acc)
    s_idx = pl.program_id(2)
    num_s = pl.num_programs(2)

    @pl.when(s_idx == 0)
    def _init():
        o_ref[...] = jnp.zeros_like(o_ref)

    if edge_mask:
        # Interior tiles: unmasked fast path (no iota / where).
        @pl.when(s_idx < num_s - 1)
        def _interior():
            h = h_ref[...].astype(jnp.float32)
            m = m_ref[...].astype(jnp.float32)
            o_ref[...] += jnp.sum(h * m, axis=1, keepdims=True)

        # Last tile: zero out-of-range rows in BOTH mask and hidden state so OOB
        # garbage (NaN/Inf) cannot poison the accumulator.
        @pl.when(s_idx == num_s - 1)
        def _tail():
            h = h_ref[...].astype(jnp.float32)
            m = m_ref[...].astype(jnp.float32)
            row = jax.lax.broadcasted_iota(jnp.int32, m.shape, dimension=1)
            valid = (s_idx * ts + row) < seq_len          # (TB, TS, 1)
            m = jnp.where(valid, m, 0.0)
            h = jnp.where(valid, h, 0.0)                  # broadcasts over TH
            o_ref[...] += jnp.sum(h * m, axis=1, keepdims=True)
    else:
        h = h_ref[...].astype(jnp.float32)
        m = m_ref[...].astype(jnp.float32)
        o_ref[...] += jnp.sum(h * m, axis=1, keepdims=True)

    @pl.when(s_idx == num_s - 1)
    def _finalize():
        o_ref[...] = o_ref[...] * inv_ref[...]            # (TB,1,TH) * (TB,1,1)


def _tpu_block_budget():
    """(target hidden-block bytes, scoped-VMEM limit bytes) per TPU generation."""
    try:
        vmem_cap = pltpu.get_tpu_info().vmem_capacity_bytes
    except Exception:
        vmem_cap = 128 * 1024 * 1024
    if vmem_cap <= 64 * 1024 * 1024:
        # v7x-class: 64 MiB VMEM, 3.2 TB/s HBM -> bigger blocks, bounded limit.
        return 6 * 1024 * 1024, 44 * 1024 * 1024
    # v5e / v6e: 128 MiB VMEM.
    return 4 * 1024 * 1024, 64 * 1024 * 1024


def _choose_tiles(B, S, H, itemsize, target_bytes, block_seq, block_hidden):
    """Pick (TB, TS, TH) for the (batch, seq, hidden) hidden-state block."""
    # Packed-sublane multiple for the hidden dtype (8 for f32, 16 for bf16, 32 for i8).
    sub = max(8, 32 // itemsize)

    TH = int(block_hidden) if block_hidden is not None else H

    if block_seq is not None:
        TS = int(min(S, block_seq))
    else:
        row_bytes = S * TH * itemsize
        if row_bytes <= target_bytes:
            TS = S                                        # whole sequence -> no tail mask
        else:
            ts = (target_bytes // (TH * itemsize)) // sub * sub
            TS = int(max(sub, min(S, ts)))

    # Fuse batch rows until the block reaches the target size. TB must divide B so
    # the batch axis never needs edge masking.
    block_bytes = TS * TH * itemsize
    TB = 1
    for d in range(1, B + 1):
        if B % d == 0 and d * block_bytes <= target_bytes:
            TB = d

    # Keep >= 2 independent "parallel" grid units so both v7x TensorCores get work
    # (neutral on single-TC v5e/v6e).
    if (B // TB) * (H // max(TH, 1)) < 2:
        if block_hidden is None and TH == H and H % 256 == 0:
            TH = H // 2                                   # lane-dense H split
        elif TB > 1:
            for d in range(TB - 1, 0, -1):                # back off batch fusion
                if B % d == 0:
                    TB = d
                    break
    return TB, TS, TH


def mean_pooling(last_hidden_state, attention_mask, *, block_seq=None, block_hidden=None):
    """Masked mean-pool over the sequence axis (matches PyTorch MeanPooling.forward).

    last_hidden_state: (B, S, H) float (any float dtype; accumulated in f32)
    attention_mask:    (B, S)    int/float
    returns:           (B, H)    float32
    """
    B, S, H = last_hidden_state.shape
    h_dtype = last_hidden_state.dtype
    itemsize = jnp.dtype(h_dtype).itemsize

    target_bytes, vmem_limit = _tpu_block_budget()
    TB, TS, TH = _choose_tiles(B, S, H, itemsize, target_bytes, block_seq, block_hidden)

    # Correctness guards (H // TH must not silently truncate output columns).
    if H % TH != 0:
        raise ValueError(f"block_hidden={TH} must divide H={H}")
    if TH != H and TH % 128 != 0:
        raise ValueError(f"block_hidden={TH} must be a multiple of 128 or equal to H={H}")
    if TS != S and TS % 8 != 0:
        raise ValueError(f"block_seq={TS} must be a multiple of 8 or equal to S={S}")
    assert B % TB == 0

    num_s = pl.cdiv(S, TS)
    num_h = H // TH
    edge_mask = (num_s * TS) != S

    # Narrow mask DMA: cast to the hidden dtype (0/1 values are exact) + trailing
    # unit dim so the block's last two dims satisfy TPU tiling rules.
    mask_dtype = h_dtype if jnp.issubdtype(h_dtype, jnp.floating) else jnp.float32
    mask3 = attention_mask.reshape(B, S, 1).astype(mask_dtype)

    # Precompute 1 / clamp(mask_count, 1e-9) in the wrapper (trivial XLA reduce);
    # applied in-kernel as a broadcast multiply at the last sequence step.
    msum = jnp.sum(attention_mask.astype(jnp.float32), axis=1)            # (B,)
    inv_denom = (1.0 / jnp.maximum(msum, 1e-9)).astype(jnp.float32).reshape(B, 1, 1)

    kernel = functools.partial(mean_pool_kernel, seq_len=S, ts=TS, edge_mask=edge_mask)

    out = pl.pallas_call(
        kernel,
        out_shape=jax.ShapeDtypeStruct((B, 1, H), jnp.float32),
        grid=(B // TB, num_h, num_s),
        in_specs=[
            pl.BlockSpec((TB, TS, TH), lambda b, h, s: (b, s, h)),
            pl.BlockSpec((TB, TS, 1), lambda b, h, s: (b, s, 0)),
            pl.BlockSpec((TB, 1, 1), lambda b, h, s: (b, 0, 0)),
        ],
        out_specs=pl.BlockSpec((TB, 1, TH), lambda b, h, s: (b, 0, h)),
        compiler_params=pltpu.CompilerParams(
            dimension_semantics=("parallel", "parallel", "arbitrary"),
            vmem_limit_bytes=vmem_limit,
        ),
    )(last_hidden_state, mask3, inv_denom)

    return out.reshape(B, H)


def _reference(hidden, mask):
    m3 = mask[..., None].astype(jnp.float32)
    hf = hidden.astype(jnp.float32)
    return jnp.sum(hf * m3, axis=1) / jnp.maximum(jnp.sum(m3, axis=1), 1e-9)


if __name__ == "__main__":
    key = jax.random.PRNGKey(0)
    k_h1, k_m1, k_h2, k_m2, k_h3, k_m3 = jax.random.split(key, 6)

    # Case 1: small f32 input, whole sequence fits in a single tile.
    B, S, H = 2, 8, 32
    hidden = jax.random.normal(k_h1, (B, S, H), dtype=jnp.float32)
    mask = (jax.random.uniform(k_m1, (B, S)) > 0.4).astype(jnp.int32)
    mask = mask.at[:, 0].set(1)  # guarantee at least one valid token per row

    out = jax.block_until_ready(mean_pooling(hidden, mask))
    ref = _reference(hidden, mask)
    assert out.shape == (B, H)
    assert jnp.allclose(out, ref, atol=1e-5, rtol=1e-5)

    # Case 2: bf16 hidden states, forced sequence tiling with a ragged last tile
    # (exercises the pl.when-gated tail-mask path + resident-output accumulation).
    B2, S2, H2 = 2, 20, 128
    hidden2 = jax.random.normal(k_h2, (B2, S2, H2), dtype=jnp.float32).astype(jnp.bfloat16)
    mask2 = (jax.random.uniform(k_m2, (B2, S2)) > 0.4).astype(jnp.int32)
    mask2 = mask2.at[:, 0].set(1)

    out2 = jax.block_until_ready(mean_pooling(hidden2, mask2, block_seq=16))
    ref2 = _reference(hidden2, mask2)
    assert out2.shape == (B2, H2)
    assert jnp.allclose(out2, ref2, atol=1e-5, rtol=1e-5)

    # Case 3: bf16, batch fusion (TB > 1) + lane-dense hidden split for the 2-TC path.
    B3, S3, H3 = 4, 16, 256
    hidden3 = jax.random.normal(k_h3, (B3, S3, H3), dtype=jnp.float32).astype(jnp.bfloat16)
    mask3 = (jax.random.uniform(k_m3, (B3, S3)) > 0.4).astype(jnp.int32)
    mask3 = mask3.at[:, 0].set(1)

    out3 = jax.block_until_ready(mean_pooling(hidden3, mask3))
    ref3 = _reference(hidden3, mask3)
    assert out3.shape == (B3, H3)
    assert jnp.allclose(out3, ref3, atol=1e-5, rtol=1e-5)

    print("KERNEL_OK")
</pallas_src>

<mosaic_0001>
module attributes {stable_mosaic.version = 11 : i64} {
  func.func @mean_pool_kernel(%arg0: i32, %arg1: i32, %arg2: i32, %arg3: memref<1x8x32xf32, #tpu.memory_space<vmem>>, %arg4: memref<1x8x1xf32, #tpu.memory_space<vmem>>, %arg5: memref<1x1x1xf32, #tpu.memory_space<vmem>>, %arg6: memref<1x1x32xf32, #tpu.memory_space<vmem>>) attributes {dimension_semantics = [#tpu.dimension_semantics<parallel>, #tpu.dimension_semantics<parallel>, #tpu.dimension_semantics<arbitrary>], iteration_bounds = array<i64: 2, 1, 1>, scalar_prefetch = 0 : i64, scratch_operands = 0 : i64, tpu.core_type = #tpu.core_type<tc>, window_params = [{transform_indices = @transform_0, window_bounds = array<i64: 1, 8, 32>}, {transform_indices = @transform_1, window_bounds = array<i64: 1, 8, 1>}, {transform_indices = @transform_2, window_bounds = array<i64: 1, 1, 1>}, {transform_indices = @transform_3, window_bounds = array<i64: 1, 1, 32>}]} {
    %c0_i32 = arith.constant 0 : i32
    %0 = arith.cmpi eq, %arg2, %c0_i32 : i32
    %1 = arith.extui %0 : i1 to i32
    %c0_i32_0 = arith.constant 0 : i32
    %2 = arith.cmpi ne, %1, %c0_i32_0 : i32
    scf.if %2 {
      %cst_14 = arith.constant 0.000000e+00 : f32
      %15 = vector.broadcast %cst_14 : f32 to vector<1x1x32xf32>
      %c0_15 = arith.constant 0 : index
      %c0_16 = arith.constant 0 : index
      %c0_17 = arith.constant 0 : index
      %16 = vector.load %arg6[%c0_15, %c0_16, %c0_17] : memref<1x1x32xf32, #tpu.memory_space<vmem>>, vector<1x1x32xf32>
      tpu.vector_store %arg6[%c0_15, %c0_16, %c0_17], %15 {strides = array<i32>} : memref<1x1x32xf32, #tpu.memory_space<vmem>>, vector<1x1x32xf32>,
    } else {
    }
    %c0 = arith.constant 0 : index
    %c0_1 = arith.constant 0 : index
    %c0_2 = arith.constant 0 : index
    %3 = vector.load %arg3[%c0, %c0_1, %c0_2] : memref<1x8x32xf32, #tpu.memory_space<vmem>>, vector<1x8x32xf32>
    %c0_3 = arith.constant 0 : index
    %c0_4 = arith.constant 0 : index
    %c0_5 = arith.constant 0 : index
    %4 = vector.load %arg4[%c0_3, %c0_4, %c0_5] : memref<1x8x1xf32, #tpu.memory_space<vmem>>, vector<1x8x1xf32>
    %c0_6 = arith.constant 0 : index
    %c0_7 = arith.constant 0 : index
    %c0_8 = arith.constant 0 : index
    %5 = vector.load %arg6[%c0_6, %c0_7, %c0_8] : memref<1x1x32xf32, #tpu.memory_space<vmem>>, vector<1x1x32xf32>
    %6 = vector.broadcast %4 : vector<1x8x1xf32> to vector<1x8x32xf32>
    %7 = arith.mulf %3, %6 : vector<1x8x32xf32>
    %cst = arith.constant dense<0.000000e+00> : vector<1x32xf32>
    %8 = vector.multi_reduction <add>, %7, %cst [1] : vector<1x8x32xf32> to vector<1x32xf32>
    %9 = vector.shape_cast %8 : vector<1x32xf32> to vector<1x1x32xf32>
    %10 = arith.addf %5, %9 : vector<1x1x32xf32>
    %c0_9 = arith.constant 0 : index
    %c0_10 = arith.constant 0 : index
    %c0_11 = arith.constant 0 : index
    %11 = vector.load %arg6[%c0_9, %c0_10, %c0_11] : memref<1x1x32xf32, #tpu.memory_space<vmem>>, vector<1x1x32xf32>
    tpu.vector_store %arg6[%c0_9, %c0_10, %c0_11], %10 {strides = array<i32>} : memref<1x1x32xf32, #tpu.memory_space<vmem>>, vector<1x1x32xf32>,
    %c0_i32_12 = arith.constant 0 : i32
    %12 = arith.cmpi eq, %arg2, %c0_i32_12 : i32
    %13 = arith.extui %12 : i1 to i32
    %c0_i32_13 = arith.constant 0 : i32
    %14 = arith.cmpi ne, %13, %c0_i32_13 : i32
    scf.if %14 {
      %c0_14 = arith.constant 0 : index
      %c0_15 = arith.constant 0 : index
      %c0_16 = arith.constant 0 : index
      %15 = vector.load %arg6[%c0_14, %c0_15, %c0_16] : memref<1x1x32xf32, #tpu.memory_space<vmem>>, vector<1x1x32xf32>
      %c0_17 = arith.constant 0 : index
      %c0_18 = arith.constant 0 : index
      %c0_19 = arith.constant 0 : index
      %16 = vector.load %arg5[%c0_17, %c0_18, %c0_19] : memref<1x1x1xf32, #tpu.memory_space<vmem>>, vector<1x1x1xf32>
      %17 = vector.broadcast %16 : vector<1x1x1xf32> to vector<1x1x32xf32>
      %18 = arith.mulf %15, %17 : vector<1x1x32xf32>
      %c0_20 = arith.constant 0 : index
      %c0_21 = arith.constant 0 : index
      %c0_22 = arith.constant 0 : index
      %19 = vector.load %arg6[%c0_20, %c0_21, %c0_22] : memref<1x1x32xf32, #tpu.memory_space<vmem>>, vector<1x1x32xf32>
      tpu.vector_store %arg6[%c0_20, %c0_21, %c0_22], %18 {strides = array<i32>} : memref<1x1x32xf32, #tpu.memory_space<vmem>>, vector<1x1x32xf32>,
    } else {
    }
    return
  }
  func.func @transform_0(%arg0: i32, %arg1: i32, %arg2: i32) -> (i32, i32, i32) {
    %c0_i32 = arith.constant 0 : i32
    return %arg0, %arg2, %arg1 : i32, i32, i32
  }
  func.func @transform_1(%arg0: i32, %arg1: i32, %arg2: i32) -> (i32, i32, i32) {
    %c0_i32 = arith.constant 0 : i32
    %c0_i32_0 = arith.constant 0 : i32
    return %arg0, %arg2, %c0_i32 : i32, i32, i32
  }
  func.func @transform_2(%arg0: i32, %arg1: i32, %arg2: i32) -> (i32, i32, i32) {
    %c0_i32 = arith.constant 0 : i32
    %c0_i32_0 = arith.constant 0 : i32
    %c0_i32_1 = arith.constant 0 : i32
    return %arg0, %c0_i32, %c0_i32_0 : i32, i32, i32
  }
  func.func @transform_3(%arg0: i32, %arg1: i32, %arg2: i32) -> (i32, i32, i32) {
    %c0_i32 = arith.constant 0 : i32
    %c0_i32_0 = arith.constant 0 : i32
    return %arg0, %c0_i32, %arg1 : i32, i32, i32
  }
}

</mosaic_0001>

<bundles_post_ra>
// kernel: tpu_custom_call.1
= control target key start
LH: loop header
LB: loop body
LE: loop exit
PB: predicated region body
PF: predicated region fallthrough
CT: control target
= control target key end

     0   :  { %s1027_s0 = inlined_call_operand.hbm [shape: f32[2,8,32], index: 0, kind: input, shape index: {}]   ;;  %s1028_s1 = inlined_call_operand.hbm [shape: f32[2,8,1], index: 1, kind: input, shape index: {}]   ;;  %s1029_s2 = inlined_call_operand.hbm [shape: f32[2,1,1], index: 2, kind: input, shape index: {}]   ;;  %s1030_s3 = inlined_call_operand.hbm [shape: f32[2,1,32], index: 3, kind: output, shape index: {}]  }
   0x1   :  { %1035 = sst [smem:[#allocation13_spill]] %s1028_s1 }
   0x2   :  { %8 = vsyncpa [#allocation3], 0 }
   0x3   :  { %10 = vsyncpa [#allocation3 + $0x1], 0 }
   0x4   :  { %11 = vsyncpa [#allocation6], 0 }
   0x5   :  { %13 = vsyncpa [#allocation6 + $0x1], 0 }
   0x6   :  { %14 = vsyncpa [#allocation4], 0 }
   0x7   :  { %16 = vsyncpa [#allocation4 + $0x1], 0  ;;  %s754_s12 = smov 0   ;;  %s756_s13 = smov 0  }
   0x8   :  { %s758_s14 = smov 0   ;;  %s760_s15 = smov 0  }
   0x9   :  { %s762_s16 = smov 0   ;;  %s764_s17 = smov 0  }
   0xa LB: > { %s785_s18 = sadd.s32 4294967295, %s726_s17   ;;  %s461_s19 = sadd.s32 4294967294, %s726_s17   ;;  %s726_s17 = sphi %s764_s17, %s22_s17   ;;  %s722_s16 = sphi %s762_s16, %s1058_s16   ;;  %s718_s15 = sphi %s760_s15, %s1057_s15   ;;  %s714_s14 = sphi %s758_s14, %s1056_s14   ;;  %s710_s13 = sphi %s756_s13, %s1055_s13   ;;  %s706_s12 = sphi %s754_s12, %s1054_s12  }
   0xb   : > { %s41_s20 = sadd.s32 1, %s722_s16  ;;  %s52_s21 = sadd.s32 1, %s714_s14 }
   0xc   : > { %p43_p0 = scmp.ge.s32.totalorder %s41_s20, 2  ;;  %p59_p1 = scmp.ne.s32.totalorder %s714_s14, %s710_s13 }
   0xd   : > { %p60_p2 = scmp.eq.s32.totalorder %s726_s17, 0  ;;  %p65_p3 = scmp.ne.s32.totalorder %s710_s13, %s706_s12 }
   0xe   : > { %s1060_s20 = smov (%p43_p0, %s41_s20), 0  ;;  %p66_p5 = scmp.eq.s32.totalorder %s785_s18, 0 }
   0xf   : > { %1036 = sst [smem:[#allocation12_spill]] %s1060_s20  ;;  %p797_p4 = por %p60_p2, %p59_p1 }
  0x10   : > { %s45_s23 = ssub.s32 %s722_s16, %s1060_s20  ;;  %p145_p6 = scmp.eq.s32.totalorder %s785_s18, 1 }
  0x11   : > { %p50_p7 = scmp.eq.s32.totalorder %s45_s23, 0  ;;  %p805_p8 = por %p66_p5, %p65_p3 }
  0x12   : > { %p809_p9 = por %p145_p6, %p59_p1  ;;  %p151_p10 = scmp.eq.s32.totalorder %s461_s19, 1 }
  0x13   : > { %s1038_s24 = scalar_select %p805_p8, 1, 0 }
  0x14   : > { %s1039_s25 = scalar_select %p809_p9, 1, 0 }
  0x15   : > { %s814_s26 = scalar_select %p50_p7, %s714_s14, %s52_s21  }
  0x16   : > { %p816_p11 = por %p151_p10, %p65_p3  ;;  %p497_p13 = scmp.lt.s32.totalorder %s726_s17, 2 }
  0x17   : > { %s823_s28 = sand.u32 1, %s714_s14   ;;  %s465_s30 = sshll.u32 %s722_s16, 7 }
  0x18   : > { %s1040_s27 = scalar_select %p816_p11, 1, 0 }
  0x19   : > { %s464_s29 = sshll.u32 %s823_s28, 3  ;;  %p829_p0 = pnand %p497_p13, %p797_p4 }
  0x1a   : > { %s191_s5 = sand.u32 1, %s726_s17   ;;  %s1042_s1 = sld [smem:[#allocation13_spill]] }
  0x1b   : > { %s1041_s4 = scalar_select %p829_p0, 1, 0 }
  0x1c   : > { %s195_s9 = scalar_lea.vmem [#allocation5], %s464_s29  ;;  %s847_s11 = scalar_lea.sflag [#allocation6], %s191_s5 }
  0x1d   : > { %s203_s10 = sshll.u32 %s195_s9, 4  ;;  %p853_p4 = pneg %p829_p0  ;;  %s844_s10 = int_to_ptr.vmem [resolvable:$true] %s203_s10 }
  0x20   : > { %s839_s8 = scalar_lea.hbm %s1042_s1, %s465_s30  ;;  %s555_s6 = scalar_lea.hbm %s1042_s1, 256 }
  0x21   : > { %s550_s19 = scalar_lea.hbm %s839_s8, 128  ;;  %p556_p7 = scmp.lt.u32.totalorder %s839_s8, %s1042_s1 }
  0x22   : > { %p551_p3 = scmp.ne.s32.totalorder %s839_s8, %s550_s19  ;;  %p557_p10 = scmp.lt.u32.totalorder %s555_s6, %s550_s19 }
  0x23   : > { %p559_p12 = scmp.lt.u32.totalorder %s550_s19, %s839_s8 }
  0x24   : > { %p553_p5 = pnand %p853_p4, %p551_p3  ;;  %p558_p13 = por %p557_p10, %p556_p7 }
  0x26   : > { %p554_p6 = pneg %p553_p5  ;;  %p560_p1 = por %p559_p12, %p558_p13 }
  0x28   : > { %p561_p2 = pnand %p560_p1, %p554_p6 }
  0x2a   : > { %564 = shalt.err (!%p561_p2)
}
  0x2b   : > { %s565_s5 = scalar_lea.vmem %s844_s10, 128  ;;  %s728_s22 = smov [#allocation5]  }
  0x2c   : > { %p566_p3 = scmp.ne.s32.totalorder %s844_s10, %s565_s5  ;;  %s570_s23 = sshll.u32 %s728_s22, 4  ;;  %s571_s23 = int_to_ptr.vmem [resolvable:$false] %s570_s23 }
  0x2d   : > { %s572_s7 = scalar_lea.vmem %s571_s23, 256  ;;  %p573_p9 = scmp.lt.s32.totalorder %s844_s10, %s571_s23 }
  0x2e   : > { %p568_p5 = pnand %p566_p3, %p853_p4  ;;  %p574_p8 = scmp.lt.s32.totalorder %s572_s7, %s565_s5 }
  0x30   : > { %p569_p11 = pneg %p568_p5  ;;  %p575_p7 = por %p574_p8, %p573_p9 }
  0x32   : > { %p576_p10 = pnand %p575_p7, %p569_p11 }
  0x34   : > { %579 = shalt.err (!%p576_p10)
}
  0x35   : > { %489 = dma.hbm_to_vmem [thread:$0]  (!%p829_p0), %s839_s8, 128, %s844_s10, %s847_s11  }
  0x36   : > { %p1044_p12 = scmp.lt.s32.totalorder %s726_s17, 3  ;;  %p1045_p1 = scmp.ge.s32.totalorder %s726_s17, 1 }
  0x37   : > { %s890_s5 = scalar_lea.hbm %s1027_s0, %s465_s30  ;;  %s175_s22 = scalar_lea.vmem [#allocation2], %s464_s29 }
  0x38   : > { %p881_p2 = pnand %p1045_p1, %p1044_p12  ;;  %s184_s23 = sshll.u32 %s175_s22, 4  ;;  %s894_s23 = int_to_ptr.vmem [resolvable:$true] %s184_s23 }
  0x39   : > { %s468_s8 = sshll.u32 %s722_s16, 4  ;;  %s172_s10 = scalar_lea.sflag [#allocation3], %s823_s28 }
  0x3a   : > { %s1046_s19 = scalar_select %p881_p2, 1, 0 }
  0x3b   : > { %s580_s7 = scalar_lea.hbm %s890_s5, 128  ;;  %s585_s30 = scalar_lea.hbm %s1027_s0, 256 }
  0x3c   : > { %p581_p8 = scmp.ne.s32.totalorder %s890_s5, %s580_s7  ;;  %p586_p6 = scmp.lt.u32.totalorder %s890_s5, %s1027_s0 }
  0x3d   : > { %p587_p13 = scmp.lt.u32.totalorder %s585_s30, %s580_s7  ;;  %p589_p5 = scmp.lt.u32.totalorder %s580_s7, %s890_s5 }
  0x3e   : > { %p583_p9 = pnand %p581_p8, %p853_p4 }
  0x3f   : > { %p588_p3 = por %p587_p13, %p586_p6 }
  0x40   : > { %p584_p11 = pneg %p583_p9 }
  0x41   : > { %p590_p7 = por %p589_p5, %p588_p3 }
  0x43   : > { %p591_p10 = pnand %p590_p7, %p584_p11 }
  0x45   : > { %594 = shalt.err (!%p591_p10)
}
  0x46   : > { %s595_s29 = scalar_lea.vmem %s894_s23, 128  ;;  %s729_s1 = smov [#allocation2]  }
  0x47   : > { %p596_p12 = scmp.ne.s32.totalorder %s894_s23, %s595_s29  ;;  %s600_s22 = sshll.u32 %s729_s1, 4  ;;  %s601_s22 = int_to_ptr.vmem [resolvable:$false] %s600_s22 }
  0x48   : > { %s602_s20 = scalar_lea.vmem %s601_s22, 256  ;;  %p603_p9 = scmp.lt.s32.totalorder %s894_s23, %s601_s22 }
  0x49   : > { %p598_p1 = pnand %p596_p12, %p853_p4  ;;  %p604_p2 = scmp.lt.s32.totalorder %s602_s20, %s595_s29 }
  0x4b   : > { %p599_p8 = pneg %p598_p1  ;;  %p605_p6 = por %p604_p2, %p603_p9 }
  0x4d   : > { %p606_p13 = pnand %p605_p6, %p599_p8 }
  0x4f   : > { %609 = shalt.err (!%p606_p13)
}
  0x50   : > { %486 = dma.hbm_to_vmem [thread:$0]  (!%p829_p0), %s890_s5, 128, %s894_s23, %s172_s10  }
  0x51   : > { %s924_s30 = scalar_lea.hbm %s1029_s2, %s468_s8  ;;  %s213_s9 = scalar_lea.vmem [#allocation7], %s823_s28 }
  0x52   : > { %s220_s29 = sshll.u32 %s213_s9, 4  ;;  %s610_s1 = scalar_lea.hbm %s924_s30, 16  ;;  %s221_s29 = int_to_ptr.vmem [resolvable:$true] %s220_s29 }
  0x53   : > { %p611_p2 = scmp.ne.s32.totalorder %s924_s30, %s610_s1  ;;  %s615_s23 = scalar_lea.hbm %s1029_s2, 32 }
  0x54   : > { %p616_p5 = scmp.lt.u32.totalorder %s924_s30, %s1029_s2  ;;  %p617_p7 = scmp.lt.u32.totalorder %s615_s23, %s610_s1 }
  0x55   : > { %p613_p11 = pnand %p611_p2, %p853_p4  ;;  %p619_p12 = scmp.lt.u32.totalorder %s610_s1, %s924_s30 }
  0x56   : > { %p618_p10 = por %p617_p7, %p616_p5 }
  0x57   : > { %p614_p3 = pneg %p613_p11 }
  0x58   : > { %p620_p1 = por %p619_p12, %p618_p10 }
  0x5a   : > { %p621_p8 = pnand %p620_p1, %p614_p3 }
  0x5c   : > { %624 = shalt.err (!%p621_p8)
}
  0x5d   : > { %s625_s28 = scalar_lea.vmem %s221_s29, 16  ;;  %s730_s8 = smov [#allocation7]  }
  0x5e   : > { %p626_p9 = scmp.ne.s32.totalorder %s221_s29, %s625_s28  ;;  %s630_s7 = sshll.u32 %s730_s8, 4  ;;  %s631_s7 = int_to_ptr.vmem [resolvable:$false] %s630_s7 }
  0x5f   : > { %s632_s6 = scalar_lea.vmem %s631_s7, 32  ;;  %p633_p2 = scmp.lt.s32.totalorder %s221_s29, %s631_s7 }
  0x60   : > { %p628_p6 = pnand %p626_p9, %p853_p4  ;;  %p634_p11 = scmp.lt.s32.totalorder %s632_s6, %s625_s28 }
  0x62   : > { %p629_p13 = pneg %p628_p6  ;;  %p635_p0 = por %p634_p11, %p633_p2 }
  0x64   : > { %p636_p5 = pnand %p635_p0, %p629_p13 }
  0x66   : > { %639 = shalt.err (!%p636_p5)
}
  0x67   : > { %p1047_p7 = scmp.ne.s32.totalorder %s1041_s4, 0  ;;  %p1048_p3 = scmp.ne.s32.totalorder %s1046_s19, 0 }
  0x68   : > { %s948_s21 = sand.u32 (!%p1048_p3), 1, %s710_s13   ;;  %p1049_p4 = scmp.ne.s32.totalorder (!%p1048_p3), %s1038_s24, 0 }
  0x69   : > { %492 = dma.hbm_to_vmem [thread:$0]  (!%p1047_p7), %s924_s30, 16, %s221_s29, %s847_s11  }
  0x6a   : > { %229 = sbr.rel (%p1048_p3) target bundleno = 288 (0x120), region = 32  ;;  %s470_s9 = sshll.u32 (!%p1048_p3), %s948_s21, 3 }
  0x6b   : > { %s232_s1 = scalar_lea.sflag (!%p1048_p3), [#allocation3], %s948_s21  ;;  %s235_s22 = scalar_lea.vmem (!%p1048_p3), [#allocation2], %s470_s9 }
  0x71   : > { %693 = dma.done.wait (%p1049_p4), %s232_s1, 128  }
  0x72   : > { %695 = vsyncadd (%p1049_p4), %s232_s1, 4294967168  ;;  %s240_s4 = sand.u32 1, %s785_s18   ;;  %s244_s19 = scalar_lea.vmem [#allocation5], %s470_s9 }
  0x73   : > { %s241_s11 = scalar_lea.sflag [#allocation6], %s240_s4 }
  0x74   : > { %697 = dma.done.wait (%p1049_p4), %s241_s11, 144  }
  0x75   : > { %699 = vsyncadd (%p1049_p4), %s241_s11, 4294967152  ;;  %vm287_vm0 = vcmask 253952   ;;  %v731_v0 = vmov 0   ;;  %s962_s30 = scalar_lea.vmem [#allocation8], %s948_s21  ;;  %v732_v1 = vmov 0.0   ;;  %v290_v2 = vld [vmem:[%s244_s19] sm:$0xff]  ;;  %v319_v13 = vlaneseq }
  0x76   : > { %549 = vset.pattern.permute.xlu0 %v731_v0  ;;  %288 = vst.msk [vmem:[%s962_s30] sm:$0x1] %vm287_vm0, %v732_v1  ;;  %s252_s18 = scalar_lea.vmem [#allocation7], %s948_s21  ;;  %v289_v4 = vld [vmem:[%s235_s22] sm:$0xff]  ;;  %vm298_vm1 = vcmask 261120   ;;  %s472_s24 = sshll.u32 %s718_s15, 4 }
  0x77   : > { %294 = vperm.xlu0 %549, %v290_v2   ;;  %v313_v3 = vld [vmem:[%s252_s18] sm:$0x1]  ;;  %v320_v17 = vshrl.u32 %v319_v13, 7  ;;  %s339_s29 = sshll.u32 %s962_s30, 4  ;;  %s976_s10 = scalar_lea.hbm %s1030_s3, %s472_s24  ;;  %s978_s29 = int_to_ptr.vmem [resolvable:$true] %s339_s29 }
  0x78   : > { %s326_s20 = scalar_lea.sflag [#allocation4], %s948_s21  ;;  %s640_s28 = scalar_lea.vmem %s978_s29, 16 }
  0x79   : > { %v321_v18 = vsub.s32 0, %v320_v17  ;;  %p641_p0 = scmp.ne.s32.totalorder %s978_s29, %s640_s28  ;;  %p1050_p10 = scmp.ne.s32.totalorder %s1039_s25, 0 }
  0x7a   : > { %s733_s15 = smov [#allocation8]  }
  0x7b   : > { %316 = vperm.xlu0 %549, %v313_v3   ;;  %p642_p12 = pnand %p641_p0, %p1050_p10  ;;  %s644_s8 = sshll.u32 %s733_s15, 4  ;;  %s645_s8 = int_to_ptr.vmem [resolvable:$false] %s644_s8 }
  0x7c   : > { %s646_s7 = scalar_lea.vmem %s645_s8, 32  ;;  %p647_p8 = scmp.lt.s32.totalorder %s978_s29, %s645_s8 }
  0x7d   : > { %v291_v14 = vld [vmem:[%s962_s30] sm:$0x1]  ;;  %p643_p1 = pneg %p642_p12  ;;  %p648_p9 = scmp.lt.s32.totalorder %s646_s7, %s640_s28 }
  0x7f   : > { %p649_p6 = por %p648_p9, %p647_p8 }
  0x81   : > { %p650_p13 = pnand %p649_p6, %p643_p1 }
  0xf6   : > { %v295_v5 = vpop.permute.xlu0 %294 }
  0xf7   : > { %v297_v6 = vmul.f32 %v295_v5, %v289_v4 }
  0xf9   : > { %v299_v7 = vsel %vm298_vm1, %v297_v6, 0.0 }
  0xfa   : > { %v300_v8 = vrot.slane %v299_v7, 4  ;;  %v317_v19 = vpop.permute.xlu0 %316 }
  0xfb   : > { %v322_v20 = vrot.slane %v317_v19, %v321_v18 }
  0xfc   : > { %v301_v9 = vadd.f32 %v300_v8, %v299_v7 }
  0xfe   : > { %v302_v10 = vrot.slane %v301_v9, 2 }
 0x100   : > { %v303_v11 = vadd.f32 %v302_v10, %v301_v9 }
 0x102   : > { %v304_v12 = vrot.slane %v303_v11, 1 }
 0x104   : > { %v305_v15 = vadd.f32 %v304_v12, %v303_v11 }
 0x106   : > { %v306_v16 = vadd.f32 %v305_v15, %v291_v14 }
 0x108   : > { %308 = vst.msk [vmem:[%s962_s30] sm:$0x1] %vm287_vm0, %v306_v16 }
 0x10f   : > { %v312_v21 = vld [vmem:[%s962_s30] sm:$0x1] }
 0x110   : > { %v323_v22 = vmul.f32 %v322_v20, %v312_v21 }
 0x112   : > { %324 = vst.msk [vmem:[%s962_s30] sm:$0x1] %vm287_vm0, %v323_v22 }
 0x113   : > { %653 = shalt.err (!%p650_p13)
}
 0x114   : > { %s654_s6 = scalar_lea.hbm %s976_s10, 16  ;;  %s658_s1 = scalar_lea.hbm %s1030_s3, 32 }
 0x115   : > { %p655_p2 = scmp.ne.s32.totalorder %s976_s10, %s654_s6  ;;  %p659_p7 = scmp.lt.u32.totalorder %s976_s10, %s1030_s3 }
 0x116   : > { %p660_p3 = scmp.lt.u32.totalorder %s658_s1, %s654_s6  ;;  %p662_p0 = scmp.lt.u32.totalorder %s654_s6, %s976_s10 }
 0x117   : > { %p656_p11 = pnand %p655_p2, %p1050_p10 }
 0x118   : > { %p661_p4 = por %p660_p3, %p659_p7 }
 0x119   : > { %p657_p5 = pneg %p656_p11 }
 0x11a   : > { %p663_p12 = por %p662_p0, %p661_p4 }
 0x11c   : > { %p664_p1 = pnand %p663_p12, %p657_p5 }
 0x11e   : > { %667 = shalt.err (!%p664_p1)
}
 0x11f   : > { %481 = dma.vmem_to_hbm [thread:$0]  (%p1050_p10), %s978_s29, 16, %s976_s10, %s326_s20  }
 0x120 PF: > { %s351_s11 = sand.u32 1, %s706_s12   ;;  %p1051_p8 = scmp.ne.s32.totalorder %s1040_s27, 0 }
 0x121   : > { %p1052_p9 = scmp.ge.s32.totalorder %s726_s17, 2  ;;  %s352_s19 = scalar_lea.sflag [#allocation4], %s351_s11 }
 0x123   : > { %p494_p6 = pnand %p1052_p9, %p1051_p8 }
 0x125   : > { %701 = dma.done.wait (!%p494_p6), %s352_s19, 16  }
 0x126   : > { %703 = vsyncadd (!%p494_p6), %s352_s19, 4294967280  ;;  %s22_s17 = sadd.s32 1, %s726_s17   ;;  %s1053_s25 = sld [smem:[#allocation12_spill]] }
 0x127   : > { %p19_p13 = scmp.ge.s32.totalorder %s22_s17, 4   ;;  %s1054_s12 = smov %s710_s13 }
 0x128   : > { %s1055_s13 = smov %s714_s14  ;;  %s1056_s14 = smov %s814_s26 }
 0x129   : > { %s1057_s15 = smov %s722_s16  ;;  %21 = sbr.rel (!%p19_p13) target bundleno = 10 (0xa), region = 109 }
 0x12c   : > { %s1058_s16 = smov %s1053_s25 }
 0x130   :  { %356 = vsyncpa [#allocation3], 1 }
 0x131   :  { %358 = vsyncpa [#allocation3 + $0x1], 1 }
 0x132   :  { %359 = vsyncpa [#allocation6], 1 }
 0x133   :  { %361 = vsyncpa [#allocation6 + $0x1], 1 }
 0x134   :  { %362 = vsyncpa [#allocation4], 1 }
 0x135   :  { %364 = vsyncpa [#allocation4 + $0x1], 1 }

</bundles_post_ra>
